<compile_context>
chip_gen: v7x
topology: tpu7x:2x2x1
jax: 0.10.0
libtpu: 0.0.40
codegen_flags: <defaults>
</compile_context>

<pallas_src>
import functools

import jax
import jax.numpy as jnp
from jax.experimental import pallas as pl
from jax.experimental.pallas import tpu as pltpu


def _round_up(x, m):
    return ((x + m - 1) // m) * m


def _vmem_capacity_bytes():
    try:
        info = pltpu.get_tpu_info()
        cap = int(getattr(info, "vmem_capacity_bytes", 0) or 0)
        if cap > 0:
            return cap
    except Exception:
        pass
    return 64 * 2**20  # conservative default (v7x per-TensorCore VMEM)


_VMEM_CAP = _vmem_capacity_bytes()


# --------------------------------------------------------------------------- #
# Kernel
# --------------------------------------------------------------------------- #
def _make_kernel(fused_contraction):
    def kernel(x_ref, y_ref, wf_ref, b_ref, o_ref):
        x = x_ref[...]
        y = y_ref[...]
        wdt = wf_ref.dtype
        if fused_contraction:
            # Fusion + linear as ONE MXU contraction over K = 3*D_in.
            lhs = jnp.concatenate([x, y, x * y], axis=-1)   # f32 elementwise
            acc = jnp.dot(lhs.astype(wdt), wf_ref[...],
                          preferred_element_type=jnp.float32)
        else:
            # Conservative fallback: three accumulated dots.
            d = x.shape[-1]
            acc = jnp.dot(x.astype(wdt), wf_ref[:d, :],
                          preferred_element_type=jnp.float32)
            acc = acc + jnp.dot(y.astype(wdt), wf_ref[d:2 * d, :],
                                preferred_element_type=jnp.float32)
            acc = acc + jnp.dot((x * y).astype(wdt), wf_ref[2 * d:, :],
                                preferred_element_type=jnp.float32)
        acc = acc + b_ref[...]                               # f32 bias
        o_ref[...] = jnp.maximum(acc, 0.0).astype(o_ref.dtype)
    return kernel


# --------------------------------------------------------------------------- #
# One-time parameter preparation (hoist out of the per-call path)
# --------------------------------------------------------------------------- #
def prepare_params(w, b, input_dim, *, use_bf16=False):
    """Fold W (4*D_in, D_out) into W_f (3*D_in, Dp) and pad bias to Dp lanes.

    fused @ W == x@(W0+W2) + y@(W1-W2) + (x*y)@W3  ==  concat([x,y,x*y]) @ W_f
    """
    d_in = input_dim
    assert w.shape[0] == 4 * d_in, "expected W of shape (4*input_dim, output_dim)"
    d_out = w.shape[1]
    w_x = w[:d_in] + w[2 * d_in:3 * d_in]
    w_y = w[d_in:2 * d_in] - w[2 * d_in:3 * d_in]
    w_p = w[3 * d_in:]
    w_f = jnp.concatenate([w_x, w_y, w_p], axis=0)           # (3*D_in, D_out)

    dp = _round_up(d_out, 128)                               # lane-dense output
    if dp != d_out:
        w_f = jnp.pad(w_f, ((0, 0), (0, dp - d_out)))
        b = jnp.pad(b, (0, dp - d_out))
    if use_bf16:
        w_f = w_f.astype(jnp.bfloat16)
    return w_f, b.reshape(1, dp).astype(jnp.float32)


# --------------------------------------------------------------------------- #
# Tile planning (generation-aware via VMEM capacity)
# --------------------------------------------------------------------------- #
def _plan_tiles(M, D_in, Dp, bpe_in, bpe_w, bpe_out, vmem_cap, tm_req):
    budget = int(vmem_cap * 0.6)

    tm = max(8, min(_round_up(tm_req, 8), _round_up(M, 8)))
    # At least two row-steps so the v7x megacore (2 TCs) has work to shard.
    if M > 8 and pl.cdiv(M, tm) < 2:
        tm = max(8, _round_up(pl.cdiv(M, 2), 8))

    def footprint(tm_, tn_):
        wbuf = 1 if tn_ >= Dp else 2                  # resident => single buffer
        return (2 * 2 * tm_ * D_in * bpe_in           # x, y tiles (double buffered)
                + wbuf * 3 * D_in * tn_ * bpe_w       # folded weight tile
                + wbuf * tn_ * 4                      # bias tile (f32)
                + 2 * tm_ * tn_ * bpe_out)            # out tile (double buffered)

    tn = Dp
    while footprint(tm, tn) > budget and tn > 256:    # column-split big layers
        tn = max(256, _round_up(tn // 2, 256))
    while footprint(tm, tn) > budget and tm > 64:
        tm = max(64, _round_up(tm // 2, 8))
    return tm, tn, footprint(tm, tn)


# --------------------------------------------------------------------------- #
# pallas_call wrapper
# --------------------------------------------------------------------------- #
@functools.partial(
    jax.jit,
    static_argnames=("d_out", "tm", "single_buffer_resident", "fused_contraction"))
def _fused_linear_relu(x, y, w_f, b2, *, d_out, tm=512,
                       single_buffer_resident=True, fused_contraction=True):
    B, S, D_in = x.shape
    M = B * S
    Dp = b2.shape[1]
    bpe_in = x.dtype.itemsize
    bpe_w = w_f.dtype.itemsize
    bpe_out = x.dtype.itemsize

    tm_eff, tn, footprint = _plan_tiles(M, D_in, Dp, bpe_in, bpe_w, bpe_out,
                                        _VMEM_CAP, tm)
    rows = pl.cdiv(M, tm_eff)        # ragged last block handled by Pallas (no pad)
    cols = pl.cdiv(Dp, tn)

    # Capacity-derived VMEM limit with headroom for Mosaic internal scratch.
    usable = max(16 << 20, _VMEM_CAP - (12 << 20))
    vmem_limit = int(min(usable, max(32 << 20, 2 * footprint)))

    x2 = x.reshape(M, D_in)
    y2 = y.reshape(M, D_in)

    resident_w = (cols == 1)
    spec_kwargs = ({"pipeline_mode": pl.Buffered(1)}
                   if (single_buffer_resident and resident_w) else {})
    wf_spec = pl.BlockSpec((3 * D_in, tn), lambda i, j: (0, j), **spec_kwargs)
    b_spec = pl.BlockSpec((1, tn), lambda i, j: (0, j), **spec_kwargs)

    out2 = pl.pallas_call(
        _make_kernel(fused_contraction),
        out_shape=jax.ShapeDtypeStruct((M, Dp), x.dtype),
        grid_spec=pltpu.PrefetchScalarGridSpec(
            num_scalar_prefetch=0,
            grid=(rows, cols),
            in_specs=[
                pl.BlockSpec((tm_eff, D_in), lambda i, j: (i, 0)),   # x row tile
                pl.BlockSpec((tm_eff, D_in), lambda i, j: (i, 0)),   # y row tile
                wf_spec,                                             # folded W
                b_spec,                                              # bias
            ],
            out_specs=pl.BlockSpec((tm_eff, tn), lambda i, j: (i, j)),
        ),
        compiler_params=pltpu.CompilerParams(
            dimension_semantics=("parallel", "parallel"),
            vmem_limit_bytes=vmem_limit,
        ),
    )(x2, y2, w_f, b2)

    return out2[:, :d_out].reshape(B, S, d_out)


# Config fallback chain: most optimized first, progressively more conservative
# (covers environments where pipeline_mode / minor-dim concat are unsupported).
_CONFIGS = (
    dict(single_buffer_resident=True, fused_contraction=True),
    dict(single_buffer_resident=False, fused_contraction=True),
    dict(single_buffer_resident=False, fused_contraction=False),
)
_cfg_start = 0


def tensor_fusion_prepared(x, y, w_f, b2, d_out, *, tm=512):
    """Fusion + Linear + ReLU from pre-folded params (see prepare_params)."""
    global _cfg_start
    last_err = None
    for idx in range(_cfg_start, len(_CONFIGS)):
        try:
            out = _fused_linear_relu(x, y, w_f, b2, d_out=d_out, tm=tm,
                                     **_CONFIGS[idx])
            _cfg_start = idx
            return out
        except Exception as err:   # fall back to a more conservative config
            last_err = err
    raise last_err


def tensor_fusion(x, y, w, b, *, use_bf16=False, tm=512):
    """Convenience wrapper (folds params per call; prefer prepare_params + _prepared)."""
    d_in = x.shape[-1]
    d_out = w.shape[1]
    w_f, b2 = prepare_params(w, b, d_in, use_bf16=use_bf16)
    return tensor_fusion_prepared(x, y, w_f, b2, d_out, tm=tm)


# --------------------------------------------------------------------------- #
# Reference + test
# --------------------------------------------------------------------------- #
def reference(x, y, w, b):
    fused = jnp.concatenate([x, y, x - y, x * y], axis=2)
    return jnp.maximum(jnp.einsum("bsk,ko->bso", fused, w) + b, 0.0)


if __name__ == "__main__":
    key = jax.random.PRNGKey(0)
    kx, ky, kw, kb = jax.random.split(key, 4)

    # Small shapes consistent with the module's forward: (B, S, D_in).
    B, S, D_in, D_out = 2, 8, 16, 32
    x = jax.random.normal(kx, (B, S, D_in), dtype=jnp.float32)
    y = jax.random.normal(ky, (B, S, D_in), dtype=jnp.float32)
    # Linear(4*D_in, D_out) parameters stored as (4*D_in, D_out)  (= torch W.T).
    w = jax.random.normal(kw, (4 * D_in, D_out), dtype=jnp.float32) * 0.1
    b = jax.random.normal(kb, (D_out,), dtype=jnp.float32) * 0.1

    # One-time param fold, hoisted out of the per-call path.
    w_f, b2 = prepare_params(w, b, D_in)

    out = jax.block_until_ready(tensor_fusion_prepared(x, y, w_f, b2, D_out))
    ref = reference(x, y, w, b)
    assert out.shape == (B, S, D_out)
    assert jnp.allclose(out, ref, atol=1e-4, rtol=1e-4), "mismatch vs reference"

    # Ragged rows (M = 21, not a tile multiple): exercises the cdiv / masked
    # last-block path with NO jnp.pad of the inputs.
    B2, S2 = 3, 7
    x_b = jax.random.normal(kx, (B2, S2, D_in), dtype=jnp.float32)
    y_b = jax.random.normal(ky, (B2, S2, D_in), dtype=jnp.float32)
    out_b = jax.block_until_ready(tensor_fusion_prepared(x_b, y_b, w_f, b2, D_out))
    ref_b = reference(x_b, y_b, w, b)
    assert out_b.shape == (B2, S2, D_out)
    assert jnp.allclose(out_b, ref_b, atol=1e-4, rtol=1e-4), "mismatch (ragged)"

    # bf16 MXU-operand path (fast path on v6e/v7x; f32 accumulation kept).
    w_f16, b2_16 = prepare_params(w, b, D_in, use_bf16=True)
    out_16 = jax.block_until_ready(tensor_fusion_prepared(x, y, w_f16, b2_16, D_out))
    assert out_16.shape == (B, S, D_out)
    assert jnp.allclose(out_16, ref, atol=5e-2, rtol=5e-2), "mismatch (bf16 path)"

    print("KERNEL_OK")
</pallas_src>

<mosaic_0001>
module attributes {stable_mosaic.version = 11 : i64} {
  func.func @kernel(%arg0: i32, %arg1: i32, %arg2: memref<8x16xf32, #tpu.memory_space<vmem>>, %arg3: memref<8x16xf32, #tpu.memory_space<vmem>>, %arg4: memref<48x128xf32, #tpu.memory_space<vmem>>, %arg5: memref<1x128xf32, #tpu.memory_space<vmem>>, %arg6: memref<8x128xf32, #tpu.memory_space<vmem>>) attributes {dimension_semantics = [#tpu.dimension_semantics<parallel>, #tpu.dimension_semantics<parallel>], iteration_bounds = array<i64: 2, 1>, scalar_prefetch = 0 : i64, scratch_operands = 0 : i64, tpu.core_type = #tpu.core_type<tc>, window_params = [{transform_indices = @transform_0, window_bounds = array<i64: 8, 16>}, {transform_indices = @transform_1, window_bounds = array<i64: 8, 16>}, {pipeline_mode = #tpu.pipeline_mode<synchronous>, transform_indices = @transform_2, window_bounds = array<i64: 48, 128>}, {pipeline_mode = #tpu.pipeline_mode<synchronous>, transform_indices = @transform_3, window_bounds = array<i64: 1, 128>}, {transform_indices = @transform_4, window_bounds = array<i64: 8, 128>}]} {
    %c0 = arith.constant 0 : index
    %c0_0 = arith.constant 0 : index
    %0 = vector.load %arg2[%c0, %c0_0] : memref<8x16xf32, #tpu.memory_space<vmem>>, vector<8x16xf32>
    %c0_1 = arith.constant 0 : index
    %c0_2 = arith.constant 0 : index
    %1 = vector.load %arg3[%c0_1, %c0_2] : memref<8x16xf32, #tpu.memory_space<vmem>>, vector<8x16xf32>
    %2 = arith.mulf %0, %1 : vector<8x16xf32>
    %3 = tpu.concatenate %0, %1, %2 in 1 : vector<8x16xf32>, vector<8x16xf32>, vector<8x16xf32> -> vector<8x48xf32>
    %c0_3 = arith.constant 0 : index
    %c0_4 = arith.constant 0 : index
    %4 = vector.load %arg4[%c0_3, %c0_4] : memref<48x128xf32, #tpu.memory_space<vmem>>, vector<48x128xf32>
    %cst = arith.constant dense<0.000000e+00> : vector<8x128xf32>
    %5 = tpu.matmul %3, %4, %cst {dimension_numbers = #tpu.dot_dimension_numbers<[1], [0], [0], [1], [0, 0, 1, 1], [], []>} : vector<8x48xf32>, vector<48x128xf32>, vector<8x128xf32> -> vector<8x128xf32>
    %c0_5 = arith.constant 0 : index
    %c0_6 = arith.constant 0 : index
    %6 = vector.load %arg5[%c0_5, %c0_6] : memref<1x128xf32, #tpu.memory_space<vmem>>, vector<1x128xf32>
    %7 = vector.broadcast %6 : vector<1x128xf32> to vector<8x128xf32>
    %8 = arith.addf %5, %7 : vector<8x128xf32>
    %cst_7 = arith.constant 0.000000e+00 : f32
    %9 = vector.broadcast %cst_7 : f32 to vector<8x128xf32>
    %10 = arith.maximumf %8, %9 : vector<8x128xf32>
    %c0_8 = arith.constant 0 : index
    %c0_9 = arith.constant 0 : index
    %11 = vector.load %arg6[%c0_8, %c0_9] : memref<8x128xf32, #tpu.memory_space<vmem>>, vector<8x128xf32>
    tpu.vector_store %arg6[%c0_8, %c0_9], %10 {strides = array<i32>} : memref<8x128xf32, #tpu.memory_space<vmem>>, vector<8x128xf32>,
    return
  }
  func.func @transform_0(%arg0: i32, %arg1: i32) -> (i32, i32) {
    %c0_i32 = arith.constant 0 : i32
    %c0_i32_0 = arith.constant 0 : i32
    return %arg0, %c0_i32 : i32, i32
  }
  func.func @transform_1(%arg0: i32, %arg1: i32) -> (i32, i32) {
    %c0_i32 = arith.constant 0 : i32
    %c0_i32_0 = arith.constant 0 : i32
    return %arg0, %c0_i32 : i32, i32
  }
  func.func @transform_2(%arg0: i32, %arg1: i32) -> (i32, i32) {
    %c0_i32 = arith.constant 0 : i32
    %c0_i32_0 = arith.constant 0 : i32
    return %c0_i32, %arg1 : i32, i32
  }
  func.func @transform_3(%arg0: i32, %arg1: i32) -> (i32, i32) {
    %c0_i32 = arith.constant 0 : i32
    %c0_i32_0 = arith.constant 0 : i32
    return %c0_i32, %arg1 : i32, i32
  }
  func.func @transform_4(%arg0: i32, %arg1: i32) -> (i32, i32) {
    %c0_i32 = arith.constant 0 : i32
    return %arg0, %arg1 : i32, i32
  }
}

module attributes {stable_mosaic.version = 11 : i64} {
  func.func @kernel(%arg0: i32, %arg1: i32, %arg2: memref<8x16xf32, #tpu.memory_space<vmem>>, %arg3: memref<8x16xf32, #tpu.memory_space<vmem>>, %arg4: memref<48x128xf32, #tpu.memory_space<vmem>>, %arg5: memref<1x128xf32, #tpu.memory_space<vmem>>, %arg6: memref<8x128xf32, #tpu.memory_space<vmem>>) attributes {dimension_semantics = [#tpu.dimension_semantics<parallel>, #tpu.dimension_semantics<parallel>], iteration_bounds = array<i64: 2, 1>, scalar_prefetch = 0 : i64, scratch_operands = 0 : i64, tpu.core_type = #tpu.core_type<tc>, window_params = [{transform_indices = @transform_0, window_bounds = array<i64: 8, 16>}, {transform_indices = @transform_1, window_bounds = array<i64: 8, 16>}, {transform_indices = @transform_2, window_bounds = array<i64: 48, 128>}, {transform_indices = @transform_3, window_bounds = array<i64: 1, 128>}, {transform_indices = @transform_4, window_bounds = array<i64: 8, 128>}]} {
    %c0 = arith.constant 0 : index
    %c0_0 = arith.constant 0 : index
    %0 = vector.load %arg2[%c0, %c0_0] : memref<8x16xf32, #tpu.memory_space<vmem>>, vector<8x16xf32>
    %c0_1 = arith.constant 0 : index
    %c0_2 = arith.constant 0 : index
    %1 = vector.load %arg3[%c0_1, %c0_2] : memref<8x16xf32, #tpu.memory_space<vmem>>, vector<8x16xf32>
    %2 = arith.mulf %0, %1 : vector<8x16xf32>
    %3 = tpu.concatenate %0, %1, %2 in 1 : vector<8x16xf32>, vector<8x16xf32>, vector<8x16xf32> -> vector<8x48xf32>
    %c0_3 = arith.constant 0 : index
    %c0_4 = arith.constant 0 : index
    %4 = vector.load %arg4[%c0_3, %c0_4] : memref<48x128xf32, #tpu.memory_space<vmem>>, vector<48x128xf32>
    %cst = arith.constant dense<0.000000e+00> : vector<8x128xf32>
    %5 = tpu.matmul %3, %4, %cst {dimension_numbers = #tpu.dot_dimension_numbers<[1], [0], [0], [1], [0, 0, 1, 1], [], []>} : vector<8x48xf32>, vector<48x128xf32>, vector<8x128xf32> -> vector<8x128xf32>
    %c0_5 = arith.constant 0 : index
    %c0_6 = arith.constant 0 : index
    %6 = vector.load %arg5[%c0_5, %c0_6] : memref<1x128xf32, #tpu.memory_space<vmem>>, vector<1x128xf32>
    %7 = vector.broadcast %6 : vector<1x128xf32> to vector<8x128xf32>
    %8 = arith.addf %5, %7 : vector<8x128xf32>
    %cst_7 = arith.constant 0.000000e+00 : f32
    %9 = vector.broadcast %cst_7 : f32 to vector<8x128xf32>
    %10 = arith.maximumf %8, %9 : vector<8x128xf32>
    %c0_8 = arith.constant 0 : index
    %c0_9 = arith.constant 0 : index
    %11 = vector.load %arg6[%c0_8, %c0_9] : memref<8x128xf32, #tpu.memory_space<vmem>>, vector<8x128xf32>
    tpu.vector_store %arg6[%c0_8, %c0_9], %10 {strides = array<i32>} : memref<8x128xf32, #tpu.memory_space<vmem>>, vector<8x128xf32>,
    return
  }
  func.func @transform_0(%arg0: i32, %arg1: i32) -> (i32, i32) {
    %c0_i32 = arith.constant 0 : i32
    %c0_i32_0 = arith.constant 0 : i32
    return %arg0, %c0_i32 : i32, i32
  }
  func.func @transform_1(%arg0: i32, %arg1: i32) -> (i32, i32) {
    %c0_i32 = arith.constant 0 : i32
    %c0_i32_0 = arith.constant 0 : i32
    return %arg0, %c0_i32 : i32, i32
  }
  func.func @transform_2(%arg0: i32, %arg1: i32) -> (i32, i32) {
    %c0_i32 = arith.constant 0 : i32
    %c0_i32_0 = arith.constant 0 : i32
    return %c0_i32, %arg1 : i32, i32
  }
  func.func @transform_3(%arg0: i32, %arg1: i32) -> (i32, i32) {
    %c0_i32 = arith.constant 0 : i32
    %c0_i32_0 = arith.constant 0 : i32
    return %c0_i32, %arg1 : i32, i32
  }
  func.func @transform_4(%arg0: i32, %arg1: i32) -> (i32, i32) {
    %c0_i32 = arith.constant 0 : i32
    return %arg0, %arg1 : i32, i32
  }
}

module attributes {stable_mosaic.version = 11 : i64} {
  func.func @kernel(%arg0: i32, %arg1: i32, %arg2: memref<8x16xf32, #tpu.memory_space<vmem>>, %arg3: memref<8x16xf32, #tpu.memory_space<vmem>>, %arg4: memref<48x128xf32, #tpu.memory_space<vmem>>, %arg5: memref<1x128xf32, #tpu.memory_space<vmem>>, %arg6: memref<8x128xf32, #tpu.memory_space<vmem>>) attributes {dimension_semantics = [#tpu.dimension_semantics<parallel>, #tpu.dimension_semantics<parallel>], iteration_bounds = array<i64: 2, 1>, scalar_prefetch = 0 : i64, scratch_operands = 0 : i64, tpu.core_type = #tpu.core_type<tc>, window_params = [{transform_indices = @transform_0, window_bounds = array<i64: 8, 16>}, {transform_indices = @transform_1, window_bounds = array<i64: 8, 16>}, {transform_indices = @transform_2, window_bounds = array<i64: 48, 128>}, {transform_indices = @transform_3, window_bounds = array<i64: 1, 128>}, {transform_indices = @transform_4, window_bounds = array<i64: 8, 128>}]} {
    %c0 = arith.constant 0 : index
    %c0_0 = arith.constant 0 : index
    %0 = vector.load %arg2[%c0, %c0_0] : memref<8x16xf32, #tpu.memory_space<vmem>>, vector<8x16xf32>
    %c0_1 = arith.constant 0 : index
    %c0_2 = arith.constant 0 : index
    %1 = vector.load %arg3[%c0_1, %c0_2] : memref<8x16xf32, #tpu.memory_space<vmem>>, vector<8x16xf32>
    %c0_3 = arith.constant 0 : index
    %c0_4 = arith.constant 0 : index
    %2 = vector.load %arg4[%c0_3, %c0_4] : memref<48x128xf32, #tpu.memory_space<vmem>>, vector<16x128xf32>
    %cst = arith.constant dense<0.000000e+00> : vector<8x128xf32>
    %3 = tpu.matmul %0, %2, %cst {dimension_numbers = #tpu.dot_dimension_numbers<[1], [0], [0], [1], [0, 0, 1, 1], [], []>} : vector<8x16xf32>, vector<16x128xf32>, vector<8x128xf32> -> vector<8x128xf32>
    %c16 = arith.constant 16 : index
    %c0_5 = arith.constant 0 : index
    %4 = vector.load %arg4[%c16, %c0_5] : memref<48x128xf32, #tpu.memory_space<vmem>>, vector<16x128xf32>
    %cst_6 = arith.constant dense<0.000000e+00> : vector<8x128xf32>
    %5 = tpu.matmul %1, %4, %cst_6 {dimension_numbers = #tpu.dot_dimension_numbers<[1], [0], [0], [1], [0, 0, 1, 1], [], []>} : vector<8x16xf32>, vector<16x128xf32>, vector<8x128xf32> -> vector<8x128xf32>
    %6 = arith.addf %3, %5 : vector<8x128xf32>
    %7 = arith.mulf %0, %1 : vector<8x16xf32>
    %c32 = arith.constant 32 : index
    %c0_7 = arith.constant 0 : index
    %8 = vector.load %arg4[%c32, %c0_7] : memref<48x128xf32, #tpu.memory_space<vmem>>, vector<16x128xf32>
    %cst_8 = arith.constant dense<0.000000e+00> : vector<8x128xf32>
    %9 = tpu.matmul %7, %8, %cst_8 {dimension_numbers = #tpu.dot_dimension_numbers<[1], [0], [0], [1], [0, 0, 1, 1], [], []>} : vector<8x16xf32>, vector<16x128xf32>, vector<8x128xf32> -> vector<8x128xf32>
    %10 = arith.addf %6, %9 : vector<8x128xf32>
    %c0_9 = arith.constant 0 : index
    %c0_10 = arith.constant 0 : index
    %11 = vector.load %arg5[%c0_9, %c0_10] : memref<1x128xf32, #tpu.memory_space<vmem>>, vector<1x128xf32>
    %12 = vector.broadcast %11 : vector<1x128xf32> to vector<8x128xf32>
    %13 = arith.addf %10, %12 : vector<8x128xf32>
    %cst_11 = arith.constant 0.000000e+00 : f32
    %14 = vector.broadcast %cst_11 : f32 to vector<8x128xf32>
    %15 = arith.maximumf %13, %14 : vector<8x128xf32>
    %c0_12 = arith.constant 0 : index
    %c0_13 = arith.constant 0 : index
    %16 = vector.load %arg6[%c0_12, %c0_13] : memref<8x128xf32, #tpu.memory_space<vmem>>, vector<8x128xf32>
    tpu.vector_store %arg6[%c0_12, %c0_13], %15 {strides = array<i32>} : memref<8x128xf32, #tpu.memory_space<vmem>>, vector<8x128xf32>,
    return
  }
  func.func @transform_0(%arg0: i32, %arg1: i32) -> (i32, i32) {
    %c0_i32 = arith.constant 0 : i32
    %c0_i32_0 = arith.constant 0 : i32
    return %arg0, %c0_i32 : i32, i32
  }
  func.func @transform_1(%arg0: i32, %arg1: i32) -> (i32, i32) {
    %c0_i32 = arith.constant 0 : i32
    %c0_i32_0 = arith.constant 0 : i32
    return %arg0, %c0_i32 : i32, i32
  }
  func.func @transform_2(%arg0: i32, %arg1: i32) -> (i32, i32) {
    %c0_i32 = arith.constant 0 : i32
    %c0_i32_0 = arith.constant 0 : i32
    return %c0_i32, %arg1 : i32, i32
  }
  func.func @transform_3(%arg0: i32, %arg1: i32) -> (i32, i32) {
    %c0_i32 = arith.constant 0 : i32
    %c0_i32_0 = arith.constant 0 : i32
    return %c0_i32, %arg1 : i32, i32
  }
  func.func @transform_4(%arg0: i32, %arg1: i32) -> (i32, i32) {
    %c0_i32 = arith.constant 0 : i32
    return %arg0, %arg1 : i32, i32
  }
}

</mosaic_0001>

<bundles_post_ra>
// kernel: _fused_linear_relu.1
= control target key start
LH: loop header
LB: loop body
LE: loop exit
PB: predicated region body
PF: predicated region fallthrough
CT: control target
= control target key end

     0   :  { %9 = vsyncpa [#allocation3], 0  ;;  %s1044_s0 = inlined_call_operand.hbm [shape: f32[16,16], index: 0, kind: input, shape index: {}]   ;;  %s1045_s1 = inlined_call_operand.hbm [shape: f32[16,16], index: 1, kind: input, shape index: {}]   ;;  %s1046_s2 = inlined_call_operand.hbm [shape: f32[48,128], index: 2, kind: input, shape index: {}]   ;;  %s1047_s3 = inlined_call_operand.vmem [shape: f32[1,128], index: 3, kind: input, shape index: {}]   ;;  %s1048_s4 = inlined_call_operand.vmem [shape: f32[16,128], index: 4, kind: output, shape index: {}]  }
   0x1   :  { %11 = vsyncpa [#allocation3 + $0x1], 0 }
   0x2   :  { %12 = vsyncpa [#allocation5], 0 }
   0x3   :  { %14 = vsyncpa [#allocation5 + $0x1], 0  ;;  %s849_s15 = smov 0   ;;  %s851_s16 = smov 0  }
   0x4   :  { %s853_s17 = smov 0   ;;  %s855_s18 = smov 0  }
   0x5   :  { %s857_s19 = smov 0   ;;  %s859_s20 = smov 0  }
   0x6 LB: > { %s1053_s21 = sadd.s32 4294967295, %s812_s20   ;;  %p52_p0 = scmp.ne.s32.totalorder %s796_s16, %s792_s15  ;;  %s812_s20 = sphi %s859_s20, %s20_s20   ;;  %s808_s19 = sphi %s857_s19, %s1067_s19   ;;  %s804_s18 = sphi %s855_s18, %s1066_s18   ;;  %s800_s17 = sphi %s853_s17, %s1065_s17   ;;  %s796_s16 = sphi %s851_s16, %s1064_s16   ;;  %s792_s15 = sphi %s849_s15, %s1063_s15  }
   0x7   : > { %p881_p1 = scmp.eq.s32.totalorder %s1053_s21, 0  ;;  %p540_p2 = scmp.ge.s32.totalorder %s812_s20, 1 }
   0x8   : > { %p169_p3 = scmp.lt.s32.totalorder %s812_s20, 3  ;;  %s814_s25 = smov [#allocation6]  }
   0x9   : > { %s1054_s22 = scalar_select %p881_p1, 1, 0 }
   0xa   : > { %p889_p4 = por %p881_p1, %p52_p0  ;;  %p893_p5 = pnand %p540_p2, %p169_p3 }
   0xb   : > { %s183_s26 = sshll.u32 %s814_s25, 4  ;;  %s32_s28 = sadd.s32 1, %s808_s19  ;;  %s184_s26 = int_to_ptr.vmem [resolvable:$true] %s183_s26 }
   0xc   : > { %s1055_s23 = scalar_select %p889_p4, 1, 0 }
   0xd   : > { %s1056_s24 = scalar_select %p893_p5, 1, 0 }
   0xe   : > { %p596_p6 = pneg %p893_p5  ;;  %s666_s5 = scalar_lea.hbm %s1046_s2, 768 }
   0xf   : > { %p667_p8 = scmp.ne.s32.totalorder %s1046_s2, %s666_s5  ;;  %p673_p12 = scmp.lt.u32.totalorder %s666_s5, %s1046_s2 }
  0x10   : > { %p901_p7 = pnand %p596_p6, %p881_p1 }
  0x12   : > { %p668_p9 = pneg %p901_p7 }
  0x14   : > { %p669_p10 = pnand %p668_p9, %p667_p8 }
  0x16   : > { %p670_p11 = pneg %p669_p10 }
  0x18   : > { %p675_p13 = pnand %p673_p12, %p670_p11 }
  0x1a   : > { %678 = shalt.err (!%p675_p13)
}
  0x1b   : > { %s679_s10 = scalar_lea.vmem %s184_s26, 768  ;;  %p687_p6 = scmp.lt.s32.totalorder %s184_s26, %s184_s26 }
  0x1c   : > { %p680_p0 = scmp.ne.s32.totalorder %s184_s26, %s679_s10  ;;  %p688_p1 = scmp.lt.s32.totalorder %s679_s10, %s679_s10 }
  0x1e   : > { %p682_p2 = pnand %p680_p0, %p668_p9  ;;  %p689_p4 = por %p688_p1, %p687_p6 }
  0x20   : > { %p683_p3 = pneg %p682_p2 }
  0x22   : > { %p690_p5 = pnand %p689_p4, %p683_p3 }
  0x24   : > { %693 = shalt.err (!%p690_p5)
}
  0x25   : > { %s815_s11 = smov 128   ;;  %s816_s12 = smov 8  }
  0x26   : > { %599 = dma.hbm_to_vmem [thread:$0]  (!%p901_p7), %s1046_s2, 768, %s184_s26, [#allocation5], %s815_s11, %s815_s11, %s816_s12  }
  0x27   : > { %p34_p1 = scmp.ge.s32.totalorder %s32_s28, 2  ;;  %s39_s15 = sadd.s32 1, %s800_s17 }
  0x28   : > { %p46_p4 = scmp.ne.s32.totalorder %s800_s17, %s796_s16  ;;  %p47_p5 = scmp.eq.s32.totalorder %s812_s20, 0 }
  0x29   : > { %s1069_s28 = smov (%p34_p1, %s32_s28), 0  ;;  %p608_p9 = scmp.lt.s32.totalorder %s812_s20, 2 }
  0x2a   : > { %p48_p8 = por %p47_p5, %p46_p4  ;;  %s36_s25 = ssub.s32 %s808_s19, %s1069_s28 }
  0x2b   : > { %s203_s29 = sand.u32 1, %s800_s17   ;;  %p37_p10 = scmp.eq.s32.totalorder %s36_s25, 0 }
  0x2c   : > { %s932_s30 = sshll.u32 %s203_s29, 3  ;;  %s545_s27 = sshll.u32 %s808_s19, 7 }
  0x2d   : > { %s936_s5 = scalar_select %p37_p10, %s800_s17, %s39_s15  }
  0x2e   : > { %s941_s7 = scalar_lea.hbm %s1044_s0, %s545_s27  ;;  %s207_s8 = scalar_lea.vmem [#allocation2], %s932_s30 }
  0x2f   : > { %s214_s9 = sshll.u32 %s207_s8, 4  ;;  %p944_p7 = pnand %p608_p9, %p48_p8  ;;  %s948_s9 = int_to_ptr.vmem [resolvable:$true] %s214_s9 }
  0x30   : > { %s953_s13 = scalar_lea.hbm %s1045_s1, %s545_s27  ;;  %s204_s14 = scalar_lea.sflag [#allocation3], %s203_s29 }
  0x31   : > { %s694_s15 = scalar_lea.hbm %s941_s7, 128  ;;  %p696_p12 = pneg %p944_p7 }
  0x32   : > { %p695_p11 = scmp.ne.s32.totalorder %s941_s7, %s694_s15  ;;  %s699_s26 = scalar_lea.hbm %s1044_s0, 256 }
  0x33   : > { %p700_p2 = scmp.lt.u32.totalorder %s941_s7, %s1044_s0  ;;  %p701_p3 = scmp.lt.u32.totalorder %s699_s26, %s694_s15 }
  0x34   : > { %p697_p13 = pnand %p696_p12, %p695_p11  ;;  %p703_p1 = scmp.lt.u32.totalorder %s694_s15, %s941_s7 }
  0x35   : > { %p702_p6 = por %p701_p3, %p700_p2 }
  0x36   : > { %p698_p0 = pneg %p697_p13 }
  0x37   : > { %p704_p4 = por %p703_p1, %p702_p6 }
  0x39   : > { %p705_p5 = pnand %p704_p4, %p698_p0 }
  0x3b   : > { %708 = shalt.err (!%p705_p5)
}
  0x3c   : > { %s709_s29 = scalar_lea.vmem %s948_s9, 128  ;;  %s817_s27 = smov [#allocation2]  }
  0x3d   : > { %p710_p8 = scmp.ne.s32.totalorder %s948_s9, %s709_s29  ;;  %s714_s11 = sshll.u32 %s817_s27, 4  ;;  %s715_s11 = int_to_ptr.vmem [resolvable:$false] %s714_s11 }
  0x3e   : > { %s716_s21 = scalar_lea.vmem %s715_s11, 256  ;;  %p717_p11 = scmp.lt.s32.totalorder %s948_s9, %s715_s11 }
  0x3f   : > { %p712_p9 = pnand %p710_p8, %p696_p12  ;;  %p718_p13 = scmp.lt.s32.totalorder %s716_s21, %s709_s29 }
  0x41   : > { %p713_p10 = pneg %p712_p9  ;;  %p719_p2 = por %p718_p13, %p717_p11 }
  0x43   : > { %p720_p3 = pnand %p719_p2, %p713_p10 }
  0x45   : > { %723 = shalt.err (!%p720_p3)
}
  0x46   : > { %603 = dma.hbm_to_vmem [thread:$0]  (!%p944_p7), %s941_s7, 128, %s948_s9, %s204_s14  }
  0x47   : > { %s221_s12 = sand.u32 1, %s812_s20   ;;  %s225_s15 = scalar_lea.vmem [#allocation4], %s932_s30 }
  0x48   : > { %s232_s25 = sshll.u32 %s225_s15, 4  ;;  %s222_s6 = scalar_lea.sflag [#allocation5], %s221_s12  ;;  %s233_s25 = int_to_ptr.vmem [resolvable:$true] %s232_s25 }
  0x49   : > { %s724_s26 = scalar_lea.hbm %s953_s13, 128  ;;  %s729_s27 = scalar_lea.hbm %s1045_s1, 256 }
  0x4a   : > { %p725_p0 = scmp.ne.s32.totalorder %s953_s13, %s724_s26  ;;  %p730_p4 = scmp.lt.u32.totalorder %s953_s13, %s1045_s1 }
  0x4b   : > { %p731_p5 = scmp.lt.u32.totalorder %s729_s27, %s724_s26  ;;  %p733_p9 = scmp.lt.u32.totalorder %s724_s26, %s953_s13 }
  0x4c   : > { %p727_p6 = pnand %p725_p0, %p696_p12 }
  0x4d   : > { %p732_p8 = por %p731_p5, %p730_p4 }
  0x4e   : > { %p728_p1 = pneg %p727_p6 }
  0x4f   : > { %p734_p10 = por %p733_p9, %p732_p8 }
  0x51   : > { %p735_p11 = pnand %p734_p10, %p728_p1 }
  0x53   : > { %738 = shalt.err (!%p735_p11)
}
  0x54   : > { %s739_s30 = scalar_lea.vmem %s233_s25, 128  ;;  %s818_s7 = smov [#allocation4]  }
  0x55   : > { %p740_p13 = scmp.ne.s32.totalorder %s233_s25, %s739_s30  ;;  %s744_s9 = sshll.u32 %s818_s7, 4  ;;  %s745_s9 = int_to_ptr.vmem [resolvable:$false] %s744_s9 }
  0x56   : > { %s746_s14 = scalar_lea.vmem %s745_s9, 256  ;;  %p747_p0 = scmp.lt.s32.totalorder %s233_s25, %s745_s9 }
  0x57   : > { %p742_p2 = pnand %p740_p13, %p696_p12  ;;  %p748_p6 = scmp.lt.s32.totalorder %s746_s14, %s739_s30 }
  0x59   : > { %p743_p3 = pneg %p742_p2  ;;  %p749_p4 = por %p748_p6, %p747_p0 }
  0x5b   : > { %p750_p5 = pnand %p749_p4, %p743_p3 }
  0x5d   : > { %753 = shalt.err (!%p750_p5)
}
  0x5e   : > { %606 = dma.hbm_to_vmem [thread:$0]  (!%p944_p7), %s953_s13, 128, %s233_s25, %s222_s6  }
  0x5f   : > { %p1059_p1 = scmp.ne.s32.totalorder %s1056_s24, 0 }
  0x60   : > { %s243_s12 = sand.u32 (!%p1059_p1), 1, %s796_s16   ;;  %p1060_p12 = scmp.ne.s32.totalorder (!%p1059_p1), %s1055_s23, 0 }
  0x61   : > { %241 = sbr.rel (%p1059_p1) target bundleno = 451 (0x1c3), region = 36  ;;  %s549_s15 = sshll.u32 (!%p1059_p1), %s243_s12, 3 }
  0x62   : > { %s244_s26 = scalar_lea.sflag (!%p1059_p1), [#allocation3], %s243_s12  ;;  %s247_s8 = scalar_lea.vmem (!%p1059_p1), [#allocation2], %s549_s15 }
  0x68   : > { %779 = dma.done.wait (%p1060_p12), %s244_s26, 128  }
  0x69   : > { %781 = vsyncadd (%p1060_p12), %s244_s26, 4294967168  ;;  %s1061_s29 = sadd.s32 4294967295, %s812_s20   ;;  %s256_s13 = scalar_lea.vmem [#allocation4], %s549_s15 }
  0x6a   : > { %s252_s10 = sand.u32 1, %s1061_s29  }
  0x6b   : > { %s253_s27 = scalar_lea.sflag [#allocation5], %s252_s10 }
  0x6c   : > { %783 = dma.done.wait (%p1060_p12), %s253_s27, 128  }
  0x6d   : > { %785 = vsyncadd (%p1060_p12), %s253_s27, 4294967168  ;;  %p1062_p7 = scmp.ne.s32.totalorder %s1054_s22, 0 }
  0x6f   : > { %787 = dma.done.wait (%p1062_p7), [#allocation5], 768  }
  0x70   : > { %789 = vsyncadd (%p1062_p7), [#allocation5], 4294966528  ;;  %v819_v0 = vmov 0.0|0.0   ;;  %vm820_vm0 = vmmov 0   ;;  %v821_v1 = vmov 0.0   ;;  %v306_v2 = vld [vmem:[%s256_s13] sm:$0xff] }
  0x71   : > { %579 = vmatprep.subr.bf16.mxu0 %v819_v0  ;;  %576 = vmatprep.mubr.msk.f32.mxu0 %vm820_vm0, %v821_v1  ;;  %v305_v3 = vld [vmem:[%s247_s8] sm:$0xff]  ;;  %s822_s24 = smov 16   ;;  %v322_v7 = vld [vmem:[#allocation6 + $0x10] sm:$0xff]  ;;  %v323_v8 = vld [vmem:[#allocation6 + $0x18] sm:$0xff]  ;;  %s823_s23 = smov 32   ;;  %vm316_vm1 = vcmask 130048  }
  0x72   : > { %v320_v4 = vld [vmem:[#allocation6] sm:$0xff]  ;;  %309 = vrot.lane.b32.xlu0 %v306_v2, %s822_s24  ;;  %v307_v5 = vmul.f32 %v306_v2, %v305_v3  ;;  %v321_v6 = vld [vmem:[#allocation6 + $0x8] sm:$0xff]  ;;  %v583_v10 = vpack.c.bf16 %v323_v8, %v322_v7  ;;  %vm318_vm2 = vcmask 261120   ;;  %vm333_vm3 = vcmask 392192   ;;  %p298_p8 = scmp.lt.s32.totalorder %s804_s18, 1 }
  0x73   : > { %v580_v9 = vpack.c.bf16 %v321_v6, %v320_v4  ;;  %v324_v11 = vld [vmem:[#allocation6 + $0x20] sm:$0xff]  ;;  %v325_v12 = vld [vmem:[#allocation6 + $0x28] sm:$0xff] }
  0x74   : > { %v586_v13 = vpack.c.bf16 %v325_v12, %v324_v11  ;;  %s1071_s18 = smov (!%p298_p8, %s804_s18), 1  ;;  %v553_v18 = vld [vmem:[%s1047_s3] ss:$0 sm:$0xff] }
  0x75   : > { %581 = vmatpush3.bf16.msra.mxu0 %v580_v9  ;;  %s552_s6 = sshll.u32 %s1071_s18, 3 }
  0x76   : > { %313 = vrot.lane.b32.xlu0 %v307_v5, %s823_s23  ;;  %582 = vmatprep.subr.bf16.mxu0 %v819_v0  ;;  %s304_s30 = scalar_lea.vmem %s1048_s4, %s552_s6 }
  0x79   : > { %584 = vmatpush3.bf16.msra.mxu0 %v583_v10 }
  0x7a   : > { %585 = vmatprep.subr.bf16.mxu0 %v819_v0 }
  0x7d   : > { %587 = vmatpush3.bf16.msra.mxu0 %v586_v13 }
  0xe4   : > { %v310_v14 = vpop.permute.xlu0 %309 }
  0xe5   : > { %v317_v15 = vsel %vm316_vm1, %v305_v3, %v310_v14 }
  0xe8   : > { %v314_v16 = vpop.permute.xlu0 %313 }
  0xe9   : > { %v319_v17 = vsel %vm318_vm2, %v317_v15, %v314_v16 }
  0xea   : > { %577 = vmatmul.mubr.msk.f32.vlgmr.msra.gmra.mrb[0].mxu0 %vm333_vm3, %v319_v17 }
 0x1bd   : > { %v403_v19 = vpop.f32.mrb[0].mxu0 }
 0x1be   : > { %v404_v20 = vadd.f32 %v553_v18, %v403_v19  ;;  %v578_v21 = vpop.f32.mrb[1].mxu0 }
 0x1c0   : > { %v407_v22 = vmax.f32 %v404_v20, 0.0 }
 0x1c2   : > { %408 = vst [vmem:[%s304_s30] sm:$0xff] %v407_v22 }
 0x1c3 PF: > { %s20_s20 = sadd.s32 1, %s812_s20   ;;  %s1063_s15 = smov %s796_s16 }
 0x1c4   : > { %p17_p9 = scmp.ge.s32.totalorder %s20_s20, 4   ;;  %s1064_s16 = smov %s800_s17 }
 0x1c5   : > { %s1065_s17 = smov %s936_s5  ;;  %s1066_s18 = smov %s808_s19 }
 0x1c6   : > { %s1067_s19 = smov %s1069_s28  ;;  %19 = sbr.rel (!%p17_p9) target bundleno = 6 (0x6), region = 97 }
 0x1cd   :  { %434 = vsyncpa [#allocation3], 1 }
 0x1ce   :  { %436 = vsyncpa [#allocation3 + $0x1], 1 }
 0x1cf   :  { %437 = vsyncpa [#allocation5], 1 }
 0x1d0   :  { %439 = vsyncpa [#allocation5 + $0x1], 1 }

// kernel: _fused_linear_relu.1
= control target key start
LH: loop header
LB: loop body
LE: loop exit
PB: predicated region body
PF: predicated region fallthrough
CT: control target
= control target key end

     0   :  { %9 = vsyncpa [#allocation3], 0  ;;  %s1044_s0 = inlined_call_operand.hbm [shape: f32[16,16], index: 0, kind: input, shape index: {}]   ;;  %s1045_s1 = inlined_call_operand.hbm [shape: f32[16,16], index: 1, kind: input, shape index: {}]   ;;  %s1046_s2 = inlined_call_operand.hbm [shape: f32[48,128], index: 2, kind: input, shape index: {}]   ;;  %s1047_s3 = inlined_call_operand.vmem [shape: f32[1,128], index: 3, kind: input, shape index: {}]   ;;  %s1048_s4 = inlined_call_operand.vmem [shape: f32[16,128], index: 4, kind: output, shape index: {}]  }
   0x1   :  { %11 = vsyncpa [#allocation3 + $0x1], 0 }
   0x2   :  { %12 = vsyncpa [#allocation5], 0 }
   0x3   :  { %14 = vsyncpa [#allocation5 + $0x1], 0  ;;  %s849_s15 = smov 0   ;;  %s851_s16 = smov 0  }
   0x4   :  { %s853_s17 = smov 0   ;;  %s855_s18 = smov 0  }
   0x5   :  { %s857_s19 = smov 0   ;;  %s859_s20 = smov 0  }
   0x6 LB: > { %s1053_s21 = sadd.s32 4294967295, %s812_s20   ;;  %p52_p0 = scmp.ne.s32.totalorder %s796_s16, %s792_s15  ;;  %s812_s20 = sphi %s859_s20, %s20_s20   ;;  %s808_s19 = sphi %s857_s19, %s1067_s19   ;;  %s804_s18 = sphi %s855_s18, %s1066_s18   ;;  %s800_s17 = sphi %s853_s17, %s1065_s17   ;;  %s796_s16 = sphi %s851_s16, %s1064_s16   ;;  %s792_s15 = sphi %s849_s15, %s1063_s15  }
   0x7   : > { %p881_p1 = scmp.eq.s32.totalorder %s1053_s21, 0  ;;  %p540_p2 = scmp.ge.s32.totalorder %s812_s20, 1 }
   0x8   : > { %p169_p3 = scmp.lt.s32.totalorder %s812_s20, 3  ;;  %s814_s25 = smov [#allocation6]  }
   0x9   : > { %s1054_s22 = scalar_select %p881_p1, 1, 0 }
   0xa   : > { %p889_p4 = por %p881_p1, %p52_p0  ;;  %p893_p5 = pnand %p540_p2, %p169_p3 }
   0xb   : > { %s183_s26 = sshll.u32 %s814_s25, 4  ;;  %s32_s28 = sadd.s32 1, %s808_s19  ;;  %s184_s26 = int_to_ptr.vmem [resolvable:$true] %s183_s26 }
   0xc   : > { %s1055_s23 = scalar_select %p889_p4, 1, 0 }
   0xd   : > { %s1056_s24 = scalar_select %p893_p5, 1, 0 }
   0xe   : > { %p596_p6 = pneg %p893_p5  ;;  %s666_s5 = scalar_lea.hbm %s1046_s2, 768 }
   0xf   : > { %p667_p8 = scmp.ne.s32.totalorder %s1046_s2, %s666_s5  ;;  %p673_p12 = scmp.lt.u32.totalorder %s666_s5, %s1046_s2 }
  0x10   : > { %p901_p7 = pnand %p596_p6, %p881_p1 }
  0x12   : > { %p668_p9 = pneg %p901_p7 }
  0x14   : > { %p669_p10 = pnand %p668_p9, %p667_p8 }
  0x16   : > { %p670_p11 = pneg %p669_p10 }
  0x18   : > { %p675_p13 = pnand %p673_p12, %p670_p11 }
  0x1a   : > { %678 = shalt.err (!%p675_p13)
}
  0x1b   : > { %s679_s10 = scalar_lea.vmem %s184_s26, 768  ;;  %p687_p6 = scmp.lt.s32.totalorder %s184_s26, %s184_s26 }
  0x1c   : > { %p680_p0 = scmp.ne.s32.totalorder %s184_s26, %s679_s10  ;;  %p688_p1 = scmp.lt.s32.totalorder %s679_s10, %s679_s10 }
  0x1e   : > { %p682_p2 = pnand %p680_p0, %p668_p9  ;;  %p689_p4 = por %p688_p1, %p687_p6 }
  0x20   : > { %p683_p3 = pneg %p682_p2 }
  0x22   : > { %p690_p5 = pnand %p689_p4, %p683_p3 }
  0x24   : > { %693 = shalt.err (!%p690_p5)
}
  0x25   : > { %s815_s11 = smov 128   ;;  %s816_s12 = smov 8  }
  0x26   : > { %599 = dma.hbm_to_vmem [thread:$0]  (!%p901_p7), %s1046_s2, 768, %s184_s26, [#allocation5], %s815_s11, %s815_s11, %s816_s12  }
  0x27   : > { %p34_p1 = scmp.ge.s32.totalorder %s32_s28, 2  ;;  %s39_s15 = sadd.s32 1, %s800_s17 }
  0x28   : > { %p46_p4 = scmp.ne.s32.totalorder %s800_s17, %s796_s16  ;;  %p47_p5 = scmp.eq.s32.totalorder %s812_s20, 0 }
  0x29   : > { %s1069_s28 = smov (%p34_p1, %s32_s28), 0  ;;  %p608_p9 = scmp.lt.s32.totalorder %s812_s20, 2 }
  0x2a   : > { %p48_p8 = por %p47_p5, %p46_p4  ;;  %s36_s25 = ssub.s32 %s808_s19, %s1069_s28 }
  0x2b   : > { %s203_s29 = sand.u32 1, %s800_s17   ;;  %p37_p10 = scmp.eq.s32.totalorder %s36_s25, 0 }
  0x2c   : > { %s932_s30 = sshll.u32 %s203_s29, 3  ;;  %s545_s27 = sshll.u32 %s808_s19, 7 }
  0x2d   : > { %s936_s5 = scalar_select %p37_p10, %s800_s17, %s39_s15  }
  0x2e   : > { %s941_s7 = scalar_lea.hbm %s1044_s0, %s545_s27  ;;  %s207_s8 = scalar_lea.vmem [#allocation2], %s932_s30 }
  0x2f   : > { %s214_s9 = sshll.u32 %s207_s8, 4  ;;  %p944_p7 = pnand %p608_p9, %p48_p8  ;;  %s948_s9 = int_to_ptr.vmem [resolvable:$true] %s214_s9 }
  0x30   : > { %s953_s13 = scalar_lea.hbm %s1045_s1, %s545_s27  ;;  %s204_s14 = scalar_lea.sflag [#allocation3], %s203_s29 }
  0x31   : > { %s694_s15 = scalar_lea.hbm %s941_s7, 128  ;;  %p696_p12 = pneg %p944_p7 }
  0x32   : > { %p695_p11 = scmp.ne.s32.totalorder %s941_s7, %s694_s15  ;;  %s699_s26 = scalar_lea.hbm %s1044_s0, 256 }
  0x33   : > { %p700_p2 = scmp.lt.u32.totalorder %s941_s7, %s1044_s0  ;;  %p701_p3 = scmp.lt.u32.totalorder %s699_s26, %s694_s15 }
  0x34   : > { %p697_p13 = pnand %p696_p12, %p695_p11  ;;  %p703_p1 = scmp.lt.u32.totalorder %s694_s15, %s941_s7 }
  0x35   : > { %p702_p6 = por %p701_p3, %p700_p2 }
  0x36   : > { %p698_p0 = pneg %p697_p13 }
  0x37   : > { %p704_p4 = por %p703_p1, %p702_p6 }
  0x39   : > { %p705_p5 = pnand %p704_p4, %p698_p0 }
  0x3b   : > { %708 = shalt.err (!%p705_p5)
}
  0x3c   : > { %s709_s29 = scalar_lea.vmem %s948_s9, 128  ;;  %s817_s27 = smov [#allocation2]  }
  0x3d   : > { %p710_p8 = scmp.ne.s32.totalorder %s948_s9, %s709_s29  ;;  %s714_s11 = sshll.u32 %s817_s27, 4  ;;  %s715_s11 = int_to_ptr.vmem [resolvable:$false] %s714_s11 }
  0x3e   : > { %s716_s21 = scalar_lea.vmem %s715_s11, 256  ;;  %p717_p11 = scmp.lt.s32.totalorder %s948_s9, %s715_s11 }
  0x3f   : > { %p712_p9 = pnand %p710_p8, %p696_p12  ;;  %p718_p13 = scmp.lt.s32.totalorder %s716_s21, %s709_s29 }
  0x41   : > { %p713_p10 = pneg %p712_p9  ;;  %p719_p2 = por %p718_p13, %p717_p11 }
  0x43   : > { %p720_p3 = pnand %p719_p2, %p713_p10 }
  0x45   : > { %723 = shalt.err (!%p720_p3)
}
  0x46   : > { %603 = dma.hbm_to_vmem [thread:$0]  (!%p944_p7), %s941_s7, 128, %s948_s9, %s204_s14  }
  0x47   : > { %s221_s12 = sand.u32 1, %s812_s20   ;;  %s225_s15 = scalar_lea.vmem [#allocation4], %s932_s30 }
  0x48   : > { %s232_s25 = sshll.u32 %s225_s15, 4  ;;  %s222_s6 = scalar_lea.sflag [#allocation5], %s221_s12  ;;  %s233_s25 = int_to_ptr.vmem [resolvable:$true] %s232_s25 }
  0x49   : > { %s724_s26 = scalar_lea.hbm %s953_s13, 128  ;;  %s729_s27 = scalar_lea.hbm %s1045_s1, 256 }
  0x4a   : > { %p725_p0 = scmp.ne.s32.totalorder %s953_s13, %s724_s26  ;;  %p730_p4 = scmp.lt.u32.totalorder %s953_s13, %s1045_s1 }
  0x4b   : > { %p731_p5 = scmp.lt.u32.totalorder %s729_s27, %s724_s26  ;;  %p733_p9 = scmp.lt.u32.totalorder %s724_s26, %s953_s13 }
  0x4c   : > { %p727_p6 = pnand %p725_p0, %p696_p12 }
  0x4d   : > { %p732_p8 = por %p731_p5, %p730_p4 }
  0x4e   : > { %p728_p1 = pneg %p727_p6 }
  0x4f   : > { %p734_p10 = por %p733_p9, %p732_p8 }
  0x51   : > { %p735_p11 = pnand %p734_p10, %p728_p1 }
  0x53   : > { %738 = shalt.err (!%p735_p11)
}
  0x54   : > { %s739_s30 = scalar_lea.vmem %s233_s25, 128  ;;  %s818_s7 = smov [#allocation4]  }
  0x55   : > { %p740_p13 = scmp.ne.s32.totalorder %s233_s25, %s739_s30  ;;  %s744_s9 = sshll.u32 %s818_s7, 4  ;;  %s745_s9 = int_to_ptr.vmem [resolvable:$false] %s744_s9 }
  0x56   : > { %s746_s14 = scalar_lea.vmem %s745_s9, 256  ;;  %p747_p0 = scmp.lt.s32.totalorder %s233_s25, %s745_s9 }
  0x57   : > { %p742_p2 = pnand %p740_p13, %p696_p12  ;;  %p748_p6 = scmp.lt.s32.totalorder %s746_s14, %s739_s30 }
  0x59   : > { %p743_p3 = pneg %p742_p2  ;;  %p749_p4 = por %p748_p6, %p747_p0 }
  0x5b   : > { %p750_p5 = pnand %p749_p4, %p743_p3 }
  0x5d   : > { %753 = shalt.err (!%p750_p5)
}
  0x5e   : > { %606 = dma.hbm_to_vmem [thread:$0]  (!%p944_p7), %s953_s13, 128, %s233_s25, %s222_s6  }
  0x5f   : > { %p1059_p1 = scmp.ne.s32.totalorder %s1056_s24, 0 }
  0x60   : > { %s243_s12 = sand.u32 (!%p1059_p1), 1, %s796_s16   ;;  %p1060_p12 = scmp.ne.s32.totalorder (!%p1059_p1), %s1055_s23, 0 }
  0x61   : > { %241 = sbr.rel (%p1059_p1) target bundleno = 451 (0x1c3), region = 36  ;;  %s549_s15 = sshll.u32 (!%p1059_p1), %s243_s12, 3 }
  0x62   : > { %s244_s26 = scalar_lea.sflag (!%p1059_p1), [#allocation3], %s243_s12  ;;  %s247_s8 = scalar_lea.vmem (!%p1059_p1), [#allocation2], %s549_s15 }
  0x68   : > { %779 = dma.done.wait (%p1060_p12), %s244_s26, 128  }
  0x69   : > { %781 = vsyncadd (%p1060_p12), %s244_s26, 4294967168  ;;  %s1061_s29 = sadd.s32 4294967295, %s812_s20   ;;  %s256_s13 = scalar_lea.vmem [#allocation4], %s549_s15 }
  0x6a   : > { %s252_s10 = sand.u32 1, %s1061_s29  }
  0x6b   : > { %s253_s27 = scalar_lea.sflag [#allocation5], %s252_s10 }
  0x6c   : > { %783 = dma.done.wait (%p1060_p12), %s253_s27, 128  }
  0x6d   : > { %785 = vsyncadd (%p1060_p12), %s253_s27, 4294967168  ;;  %p1062_p7 = scmp.ne.s32.totalorder %s1054_s22, 0 }
  0x6f   : > { %787 = dma.done.wait (%p1062_p7), [#allocation5], 768  }
  0x70   : > { %789 = vsyncadd (%p1062_p7), [#allocation5], 4294966528  ;;  %v819_v0 = vmov 0.0|0.0   ;;  %vm820_vm0 = vmmov 0   ;;  %v821_v1 = vmov 0.0   ;;  %v306_v2 = vld [vmem:[%s256_s13] sm:$0xff] }
  0x71   : > { %579 = vmatprep.subr.bf16.mxu0 %v819_v0  ;;  %576 = vmatprep.mubr.msk.f32.mxu0 %vm820_vm0, %v821_v1  ;;  %v305_v3 = vld [vmem:[%s247_s8] sm:$0xff]  ;;  %s822_s24 = smov 16   ;;  %v322_v7 = vld [vmem:[#allocation6 + $0x10] sm:$0xff]  ;;  %v323_v8 = vld [vmem:[#allocation6 + $0x18] sm:$0xff]  ;;  %s823_s23 = smov 32   ;;  %vm316_vm1 = vcmask 130048  }
  0x72   : > { %v320_v4 = vld [vmem:[#allocation6] sm:$0xff]  ;;  %309 = vrot.lane.b32.xlu0 %v306_v2, %s822_s24  ;;  %v307_v5 = vmul.f32 %v306_v2, %v305_v3  ;;  %v321_v6 = vld [vmem:[#allocation6 + $0x8] sm:$0xff]  ;;  %v583_v10 = vpack.c.bf16 %v323_v8, %v322_v7  ;;  %vm318_vm2 = vcmask 261120   ;;  %vm333_vm3 = vcmask 392192   ;;  %p298_p8 = scmp.lt.s32.totalorder %s804_s18, 1 }
  0x73   : > { %v580_v9 = vpack.c.bf16 %v321_v6, %v320_v4  ;;  %v324_v11 = vld [vmem:[#allocation6 + $0x20] sm:$0xff]  ;;  %v325_v12 = vld [vmem:[#allocation6 + $0x28] sm:$0xff] }
  0x74   : > { %v586_v13 = vpack.c.bf16 %v325_v12, %v324_v11  ;;  %s1071_s18 = smov (!%p298_p8, %s804_s18), 1  ;;  %v553_v18 = vld [vmem:[%s1047_s3] ss:$0 sm:$0xff] }
  0x75   : > { %581 = vmatpush3.bf16.msra.mxu0 %v580_v9  ;;  %s552_s6 = sshll.u32 %s1071_s18, 3 }
  0x76   : > { %313 = vrot.lane.b32.xlu0 %v307_v5, %s823_s23  ;;  %582 = vmatprep.subr.bf16.mxu0 %v819_v0  ;;  %s304_s30 = scalar_lea.vmem %s1048_s4, %s552_s6 }
  0x79   : > { %584 = vmatpush3.bf16.msra.mxu0 %v583_v10 }
  0x7a   : > { %585 = vmatprep.subr.bf16.mxu0 %v819_v0 }
  0x7d   : > { %587 = vmatpush3.bf16.msra.mxu0 %v586_v13 }
  0xe4   : > { %v310_v14 = vpop.permute.xlu0 %309 }
  0xe5   : > { %v317_v15 = vsel %vm316_vm1, %v305_v3, %v310_v14 }
  0xe8   : > { %v314_v16 = vpop.permute.xlu0 %313 }
  0xe9   : > { %v319_v17 = vsel %vm318_vm2, %v317_v15, %v314_v16 }
  0xea   : > { %577 = vmatmul.mubr.msk.f32.vlgmr.msra.gmra.mrb[0].mxu0 %vm333_vm3, %v319_v17 }
 0x1bd   : > { %v403_v19 = vpop.f32.mrb[0].mxu0 }
 0x1be   : > { %v404_v20 = vadd.f32 %v553_v18, %v403_v19  ;;  %v578_v21 = vpop.f32.mrb[1].mxu0 }
 0x1c0   : > { %v407_v22 = vmax.f32 %v404_v20, 0.0 }
 0x1c2   : > { %408 = vst [vmem:[%s304_s30] sm:$0xff] %v407_v22 }
 0x1c3 PF: > { %s20_s20 = sadd.s32 1, %s812_s20   ;;  %s1063_s15 = smov %s796_s16 }
 0x1c4   : > { %p17_p9 = scmp.ge.s32.totalorder %s20_s20, 4   ;;  %s1064_s16 = smov %s800_s17 }
 0x1c5   : > { %s1065_s17 = smov %s936_s5  ;;  %s1066_s18 = smov %s808_s19 }
 0x1c6   : > { %s1067_s19 = smov %s1069_s28  ;;  %19 = sbr.rel (!%p17_p9) target bundleno = 6 (0x6), region = 97 }
 0x1cd   :  { %434 = vsyncpa [#allocation3], 1 }
 0x1ce   :  { %436 = vsyncpa [#allocation3 + $0x1], 1 }
 0x1cf   :  { %437 = vsyncpa [#allocation5], 1 }
 0x1d0   :  { %439 = vsyncpa [#allocation5 + $0x1], 1 }

// kernel: _fused_linear_relu.1
= control target key start
LH: loop header
LB: loop body
LE: loop exit
PB: predicated region body
PF: predicated region fallthrough
CT: control target
= control target key end

     0   :  { %9 = vsyncpa [#allocation3], 0  ;;  %s1195_s0 = inlined_call_operand.hbm [shape: f32[16,16], index: 0, kind: input, shape index: {}]   ;;  %s1196_s1 = inlined_call_operand.hbm [shape: f32[16,16], index: 1, kind: input, shape index: {}]   ;;  %s1197_s2 = inlined_call_operand.hbm [shape: f32[48,128], index: 2, kind: input, shape index: {}]   ;;  %s1198_s3 = inlined_call_operand.vmem [shape: f32[1,128], index: 3, kind: input, shape index: {}]   ;;  %s1199_s4 = inlined_call_operand.vmem [shape: f32[16,128], index: 4, kind: output, shape index: {}]  }
   0x1   :  { %11 = vsyncpa [#allocation3 + $0x1], 0 }
   0x2   :  { %12 = vsyncpa [#allocation5], 0 }
   0x3   :  { %14 = vsyncpa [#allocation5 + $0x1], 0  ;;  %s991_s15 = smov 0   ;;  %s993_s16 = smov 0  }
   0x4   :  { %s995_s17 = smov 0   ;;  %s997_s18 = smov 0  }
   0x5   :  { %s999_s19 = smov 0   ;;  %s1001_s20 = smov 0  }
   0x6 LB: > { %s1204_s21 = sadd.s32 4294967295, %s956_s20   ;;  %p52_p0 = scmp.ne.s32.totalorder %s940_s16, %s936_s15  ;;  %s956_s20 = sphi %s1001_s20, %s20_s20   ;;  %s952_s19 = sphi %s999_s19, %s1218_s19   ;;  %s948_s18 = sphi %s997_s18, %s1217_s18   ;;  %s944_s17 = sphi %s995_s17, %s1216_s17   ;;  %s940_s16 = sphi %s993_s16, %s1215_s16   ;;  %s936_s15 = sphi %s991_s15, %s1214_s15  }
   0x7   : > { %p1023_p1 = scmp.eq.s32.totalorder %s1204_s21, 0  ;;  %p676_p2 = scmp.ge.s32.totalorder %s956_s20, 1 }
   0x8   : > { %p169_p3 = scmp.lt.s32.totalorder %s956_s20, 3  ;;  %s958_s25 = smov [#allocation6]  }
   0x9   : > { %s1205_s22 = scalar_select %p1023_p1, 1, 0 }
   0xa   : > { %p1031_p4 = por %p1023_p1, %p52_p0  ;;  %p1035_p5 = pnand %p676_p2, %p169_p3 }
   0xb   : > { %s183_s26 = sshll.u32 %s958_s25, 4  ;;  %s32_s28 = sadd.s32 1, %s952_s19  ;;  %s184_s26 = int_to_ptr.vmem [resolvable:$true] %s183_s26 }
   0xc   : > { %s1206_s23 = scalar_select %p1031_p4, 1, 0 }
   0xd   : > { %s1207_s24 = scalar_select %p1035_p5, 1, 0 }
   0xe   : > { %p742_p6 = pneg %p1035_p5  ;;  %s810_s5 = scalar_lea.hbm %s1197_s2, 768 }
   0xf   : > { %p811_p8 = scmp.ne.s32.totalorder %s1197_s2, %s810_s5  ;;  %p817_p12 = scmp.lt.u32.totalorder %s810_s5, %s1197_s2 }
  0x10   : > { %p1043_p7 = pnand %p742_p6, %p1023_p1 }
  0x12   : > { %p812_p9 = pneg %p1043_p7 }
  0x14   : > { %p813_p10 = pnand %p812_p9, %p811_p8 }
  0x16   : > { %p814_p11 = pneg %p813_p10 }
  0x18   : > { %p819_p13 = pnand %p817_p12, %p814_p11 }
  0x1a   : > { %822 = shalt.err (!%p819_p13)
}
  0x1b   : > { %s823_s10 = scalar_lea.vmem %s184_s26, 768  ;;  %p831_p6 = scmp.lt.s32.totalorder %s184_s26, %s184_s26 }
  0x1c   : > { %p824_p0 = scmp.ne.s32.totalorder %s184_s26, %s823_s10  ;;  %p832_p1 = scmp.lt.s32.totalorder %s823_s10, %s823_s10 }
  0x1e   : > { %p826_p2 = pnand %p824_p0, %p812_p9  ;;  %p833_p4 = por %p832_p1, %p831_p6 }
  0x20   : > { %p827_p3 = pneg %p826_p2 }
  0x22   : > { %p834_p5 = pnand %p833_p4, %p827_p3 }
  0x24   : > { %837 = shalt.err (!%p834_p5)
}
  0x25   : > { %s959_s11 = smov 128   ;;  %s960_s12 = smov 8  }
  0x26   : > { %745 = dma.hbm_to_vmem [thread:$0]  (!%p1043_p7), %s1197_s2, 768, %s184_s26, [#allocation5], %s959_s11, %s959_s11, %s960_s12  }
  0x27   : > { %p34_p1 = scmp.ge.s32.totalorder %s32_s28, 2  ;;  %s39_s15 = sadd.s32 1, %s944_s17 }
  0x28   : > { %p46_p4 = scmp.ne.s32.totalorder %s944_s17, %s940_s16  ;;  %p47_p5 = scmp.eq.s32.totalorder %s956_s20, 0 }
  0x29   : > { %s1220_s28 = smov (%p34_p1, %s32_s28), 0  ;;  %p754_p9 = scmp.lt.s32.totalorder %s956_s20, 2 }
  0x2a   : > { %p48_p8 = por %p47_p5, %p46_p4  ;;  %s36_s25 = ssub.s32 %s952_s19, %s1220_s28 }
  0x2b   : > { %s203_s29 = sand.u32 1, %s944_s17   ;;  %p37_p10 = scmp.eq.s32.totalorder %s36_s25, 0 }
  0x2c   : > { %s1074_s30 = sshll.u32 %s203_s29, 3  ;;  %s681_s27 = sshll.u32 %s952_s19, 7 }
  0x2d   : > { %s1078_s5 = scalar_select %p37_p10, %s944_s17, %s39_s15  }
  0x2e   : > { %s1083_s7 = scalar_lea.hbm %s1195_s0, %s681_s27  ;;  %s207_s8 = scalar_lea.vmem [#allocation2], %s1074_s30 }
  0x2f   : > { %s214_s9 = sshll.u32 %s207_s8, 4  ;;  %p1086_p7 = pnand %p754_p9, %p48_p8  ;;  %s1090_s9 = int_to_ptr.vmem [resolvable:$true] %s214_s9 }
  0x30   : > { %s1095_s13 = scalar_lea.hbm %s1196_s1, %s681_s27  ;;  %s204_s14 = scalar_lea.sflag [#allocation3], %s203_s29 }
  0x31   : > { %s838_s15 = scalar_lea.hbm %s1083_s7, 128  ;;  %p840_p12 = pneg %p1086_p7 }
  0x32   : > { %p839_p11 = scmp.ne.s32.totalorder %s1083_s7, %s838_s15  ;;  %s843_s26 = scalar_lea.hbm %s1195_s0, 256 }
  0x33   : > { %p844_p2 = scmp.lt.u32.totalorder %s1083_s7, %s1195_s0  ;;  %p845_p3 = scmp.lt.u32.totalorder %s843_s26, %s838_s15 }
  0x34   : > { %p841_p13 = pnand %p840_p12, %p839_p11  ;;  %p847_p1 = scmp.lt.u32.totalorder %s838_s15, %s1083_s7 }
  0x35   : > { %p846_p6 = por %p845_p3, %p844_p2 }
  0x36   : > { %p842_p0 = pneg %p841_p13 }
  0x37   : > { %p848_p4 = por %p847_p1, %p846_p6 }
  0x39   : > { %p849_p5 = pnand %p848_p4, %p842_p0 }
  0x3b   : > { %852 = shalt.err (!%p849_p5)
}
  0x3c   : > { %s853_s29 = scalar_lea.vmem %s1090_s9, 128  ;;  %s961_s27 = smov [#allocation2]  }
  0x3d   : > { %p854_p8 = scmp.ne.s32.totalorder %s1090_s9, %s853_s29  ;;  %s858_s11 = sshll.u32 %s961_s27, 4  ;;  %s859_s11 = int_to_ptr.vmem [resolvable:$false] %s858_s11 }
  0x3e   : > { %s860_s21 = scalar_lea.vmem %s859_s11, 256  ;;  %p861_p11 = scmp.lt.s32.totalorder %s1090_s9, %s859_s11 }
  0x3f   : > { %p856_p9 = pnand %p854_p8, %p840_p12  ;;  %p862_p13 = scmp.lt.s32.totalorder %s860_s21, %s853_s29 }
  0x41   : > { %p857_p10 = pneg %p856_p9  ;;  %p863_p2 = por %p862_p13, %p861_p11 }
  0x43   : > { %p864_p3 = pnand %p863_p2, %p857_p10 }
  0x45   : > { %867 = shalt.err (!%p864_p3)
}
  0x46   : > { %749 = dma.hbm_to_vmem [thread:$0]  (!%p1086_p7), %s1083_s7, 128, %s1090_s9, %s204_s14  }
  0x47   : > { %s221_s12 = sand.u32 1, %s956_s20   ;;  %s225_s15 = scalar_lea.vmem [#allocation4], %s1074_s30 }
  0x48   : > { %s232_s25 = sshll.u32 %s225_s15, 4  ;;  %s222_s6 = scalar_lea.sflag [#allocation5], %s221_s12  ;;  %s233_s25 = int_to_ptr.vmem [resolvable:$true] %s232_s25 }
  0x49   : > { %s868_s26 = scalar_lea.hbm %s1095_s13, 128  ;;  %s873_s27 = scalar_lea.hbm %s1196_s1, 256 }
  0x4a   : > { %p869_p0 = scmp.ne.s32.totalorder %s1095_s13, %s868_s26  ;;  %p874_p4 = scmp.lt.u32.totalorder %s1095_s13, %s1196_s1 }
  0x4b   : > { %p875_p5 = scmp.lt.u32.totalorder %s873_s27, %s868_s26  ;;  %p877_p9 = scmp.lt.u32.totalorder %s868_s26, %s1095_s13 }
  0x4c   : > { %p871_p6 = pnand %p869_p0, %p840_p12 }
  0x4d   : > { %p876_p8 = por %p875_p5, %p874_p4 }
  0x4e   : > { %p872_p1 = pneg %p871_p6 }
  0x4f   : > { %p878_p10 = por %p877_p9, %p876_p8 }
  0x51   : > { %p879_p11 = pnand %p878_p10, %p872_p1 }
  0x53   : > { %882 = shalt.err (!%p879_p11)
}
  0x54   : > { %s883_s30 = scalar_lea.vmem %s233_s25, 128  ;;  %s962_s7 = smov [#allocation4]  }
  0x55   : > { %p884_p13 = scmp.ne.s32.totalorder %s233_s25, %s883_s30  ;;  %s888_s9 = sshll.u32 %s962_s7, 4  ;;  %s889_s9 = int_to_ptr.vmem [resolvable:$false] %s888_s9 }
  0x56   : > { %s890_s14 = scalar_lea.vmem %s889_s9, 256  ;;  %p891_p0 = scmp.lt.s32.totalorder %s233_s25, %s889_s9 }
  0x57   : > { %p886_p2 = pnand %p884_p13, %p840_p12  ;;  %p892_p6 = scmp.lt.s32.totalorder %s890_s14, %s883_s30 }
  0x59   : > { %p887_p3 = pneg %p886_p2  ;;  %p893_p4 = por %p892_p6, %p891_p0 }
  0x5b   : > { %p894_p5 = pnand %p893_p4, %p887_p3 }
  0x5d   : > { %897 = shalt.err (!%p894_p5)
}
  0x5e   : > { %752 = dma.hbm_to_vmem [thread:$0]  (!%p1086_p7), %s1095_s13, 128, %s233_s25, %s222_s6  }
  0x5f   : > { %p1210_p1 = scmp.ne.s32.totalorder %s1207_s24, 0 }
  0x60   : > { %s243_s12 = sand.u32 (!%p1210_p1), 1, %s940_s16   ;;  %p1211_p12 = scmp.ne.s32.totalorder (!%p1210_p1), %s1206_s23, 0 }
  0x61   : > { %241 = sbr.rel (%p1210_p1) target bundleno = 342 (0x156), region = 36  ;;  %s1146_s15 = sshll.u32 (!%p1210_p1), %s243_s12, 3 }
  0x62   : > { %s244_s26 = scalar_lea.sflag (!%p1210_p1), [#allocation3], %s243_s12  ;;  %s247_s8 = scalar_lea.vmem (!%p1210_p1), [#allocation2], %s1146_s15 }
  0x68   : > { %923 = dma.done.wait (%p1211_p12), %s244_s26, 128  }
  0x69   : > { %925 = vsyncadd (%p1211_p12), %s244_s26, 4294967168  ;;  %s1212_s10 = sadd.s32 4294967295, %s956_s20   ;;  %s256_s25 = scalar_lea.vmem [#allocation4], %s1146_s15 }
  0x6a   : > { %s252_s13 = sand.u32 1, %s1212_s10  }
  0x6b   : > { %s253_s24 = scalar_lea.sflag [#allocation5], %s252_s13 }
  0x6c   : > { %927 = dma.done.wait (%p1211_p12), %s253_s24, 128  }
  0x6d   : > { %929 = vsyncadd (%p1211_p12), %s253_s24, 4294967168  ;;  %p1213_p7 = scmp.ne.s32.totalorder %s1205_s22, 0 }
  0x6f   : > { %931 = dma.done.wait (%p1213_p7), [#allocation5], 768  }
  0x70   : > { %933 = vsyncadd (%p1213_p7), [#allocation5], 4294966528  ;;  %v963_v0 = vmov 0.0|0.0   ;;  %vm964_vm0 = vmmov 0   ;;  %v965_v1 = vmov 0.0   ;;  %v309_v2 = vld [vmem:[#allocation6 + $0x10] sm:$0xff] }
  0x71   : > { %725 = vmatprep.subr.bf16.mxu0 %v963_v0  ;;  %728 = vmatprep.subr.bf16.mxu1 %v963_v0  ;;  %v310_v3 = vld [vmem:[#allocation6 + $0x18] sm:$0xff]  ;;  %v307_v4 = vld [vmem:[#allocation6] sm:$0xff]  ;;  %v308_v6 = vld [vmem:[#allocation6 + $0x8] sm:$0xff]  ;;  %vm311_vm1 = vcmask 130048   ;;  %p298_p8 = scmp.lt.s32.totalorder %s948_s18, 1 }
  0x72   : > { %708 = vmatprep.mubr.msk.f32.mxu0 %vm964_vm0, %v965_v1  ;;  %715 = vmatprep.mubr.msk.f32.mxu1 %vm964_vm0, %v965_v1  ;;  %v726_v5 = vpack.c.bf16 %v310_v3, %v309_v2  ;;  %v729_v7 = vpack.c.bf16 %v308_v6, %v307_v4  ;;  %v459_v8 = vld [vmem:[#allocation6 + $0x20] sm:$0xff]  ;;  %v460_v9 = vld [vmem:[#allocation6 + $0x28] sm:$0xff]  ;;  %v306_v10 = vld [vmem:[%s256_s25] sm:$0xff] }
  0x73   : > { %v732_v11 = vpack.c.bf16 %v460_v9, %v459_v8  ;;  %v305_v12 = vld [vmem:[%s247_s8] sm:$0xff]  ;;  %s1222_s18 = smov (!%p298_p8, %s948_s18), 1 }
  0x74   : > { %727 = vmatpush3.bf16.msra.mxu0 %v726_v5  ;;  %730 = vmatpush3.bf16.msra.mxu1 %v729_v7  ;;  %v458_v13 = vmul.f32 %v306_v10, %v305_v12  ;;  %v692_v20 = vld [vmem:[%s1198_s3] ss:$0 sm:$0xff]  ;;  %s688_s6 = sshll.u32 %s1222_s18, 3 }
  0x75   : > { %731 = vmatprep.subr.bf16.mxu0 %v963_v0  ;;  %s304_s11 = scalar_lea.vmem %s1199_s4, %s688_s6 }
  0x77   : > { %709 = vmatmul.mubr.msk.f32.vlgmr.msra.gmra.mrb[0].mxu0 %vm311_vm1, %v306_v10  ;;  %716 = vmatmul.mubr.msk.f32.vlgmr.msra.gmra.mrb[0].mxu1 %vm311_vm1, %v305_v12 }
  0x78   : > { %733 = vmatpush3.bf16.msra.mxu0 %v732_v11  ;;  %722 = vmatprep.mubr.msk.f32.mxu0 %vm964_vm0, %v965_v1 }
  0x7b   : > { %723 = vmatmul.mubr.msk.f32.vlgmr.msra.gmra.mrb[2].mxu0 %vm311_vm1, %v458_v13 }
 0x14a   : > { %v381_v14 = vpop.f32.mrb[0].mxu0  ;;  %v454_v16 = vpop.f32.mrb[0].mxu1 }
 0x14b   : > { %v710_v15 = vpop.f32.mrb[1].mxu0  ;;  %v455_v17 = vadd.f32 %v454_v16, %v381_v14  ;;  %v717_v18 = vpop.f32.mrb[1].mxu1 }
 0x14e   : > { %v530_v19 = vpop.f32.mrb[2].mxu0 }
 0x14f   : > { %v534_v21 = vadd.f32 %v530_v19, %v455_v17  ;;  %v724_v22 = vpop.f32.mrb[3].mxu0 }
 0x151   : > { %v542_v23 = vadd.f32 %v692_v20, %v534_v21 }
 0x153   : > { %v543_v24 = vmax.f32 %v542_v23, 0.0 }
 0x155   : > { %544 = vst [vmem:[%s304_s11] sm:$0xff] %v543_v24 }
 0x156 PF: > { %s20_s20 = sadd.s32 1, %s956_s20   ;;  %s1214_s15 = smov %s940_s16 }
 0x157   : > { %p17_p9 = scmp.ge.s32.totalorder %s20_s20, 4   ;;  %s1215_s16 = smov %s944_s17 }
 0x158   : > { %s1216_s17 = smov %s1078_s5  ;;  %s1217_s18 = smov %s952_s19 }
 0x159   : > { %s1218_s19 = smov %s1220_s28  ;;  %19 = sbr.rel (!%p17_p9) target bundleno = 6 (0x6), region = 97 }
 0x160   :  { %570 = vsyncpa [#allocation3], 1 }
 0x161   :  { %572 = vsyncpa [#allocation3 + $0x1], 1 }
 0x162   :  { %573 = vsyncpa [#allocation5], 1 }
 0x163   :  { %575 = vsyncpa [#allocation5 + $0x1], 1 }

</bundles_post_ra>
